<compile_context>
chip_gen: v7x
topology: tpu7x:2x2x1
jax: 0.10.0
libtpu: 0.0.40
codegen_flags: <defaults>
</compile_context>

<pallas_src>
import functools

import numpy as np

import jax
import jax.numpy as jnp
from jax.experimental import pallas as pl
from jax.experimental.pallas import tpu as pltpu


# --------------------------------------------------------------------------- #
# Kernel
# --------------------------------------------------------------------------- #
def _cd_conv_kernel(nb, cin, cout, img_w, hw, x_ref, wt_ref, b_ref, m_ref, o_ref):
    """Process `nb` images per grid step with in-kernel im2col.

    x_ref : (nb, cin, hw)        raw input, lane axis = flattened spatial (h*w)
    wt_ref: (9, cout, cin)       theta-folded per-tap weights, tap t = kh*3 + kw
    b_ref : (cout, 1)            theta-folded bias
    m_ref : (9, 1, hw)           0/1 border-validity mask per tap
    o_ref : (nb, cin+cout, hw)   concat([x, leaky_relu(cd_conv(x))], channels)
    """
    # Hoisted once per grid step (not per image).
    wts = [wt_ref[t] for t in range(9)]                   # 9 x (cout, cin)
    bias_row = jnp.broadcast_to(b_ref[...], (cout, hw))   # accumulator init

    for i in range(nb):                                   # static unroll, nb <= 8
        x_img = x_ref[i]                                  # (cin, hw)
        acc = bias_row
        for t in range(9):
            dh = t // 3 - 1
            dw = t % 3 - 1
            shift = (-(dh * img_w + dw)) % hw
            if dh == 0 and dw == 0:
                tap = x_img                               # center tap: no shift/mask
            else:
                tap = pltpu.roll(x_img, shift, axis=1)    # lane rotate (XLU slot)
                tap = tap * m_ref[t]                      # zero out-of-image lanes
            acc = acc + jnp.dot(wts[t], tap,
                                preferred_element_type=jnp.float32)
        act = jnp.where(acc >= 0.0, acc, 0.1 * acc)       # LeakyReLU(0.1)
        # x passthrough at sublane offset 0, conv output right after: matches
        # torch.cat((x, act), dim=1) with no relayout on the store path.
        o_ref[i, 0:cin, :] = x_img.astype(o_ref.dtype)
        o_ref[i, cin:cin + cout, :] = act.astype(o_ref.dtype)


# --------------------------------------------------------------------------- #
# Wrapper helpers
# --------------------------------------------------------------------------- #
def _tensorcores_per_chip():
    """Best-effort detection: 'lite' generations (v5e/v6e) have 1 TensorCore."""
    try:
        kind = jax.devices()[0].device_kind.lower()
    except Exception:
        return 1
    if "lite" in kind or "v5e" in kind or "v6e" in kind or "v6" in kind:
        return 1
    return 2


def _pick_block_batch(n, per_image_bytes, multi_core, target_bytes, max_unroll=8):
    """Images per grid step.

    Single-TC chips: biggest divisor of n that fits the VMEM target (grid is a
    serial loop there, so no reason to keep it >= 2).  Dual-TC chips: keep the
    grid extent >= 2 and prefer an even extent so both cores stay balanced.
    """
    cap = max(1, min(n, max_unroll, target_bytes // max(1, per_image_bytes)))
    if multi_core and n >= 2:
        cap = min(cap, max(1, n // 2))
    divisors = [d for d in range(1, cap + 1) if n % d == 0]
    if multi_core:
        even = [d for d in divisors if (n // d) % 2 == 0]
        if even:
            return max(even)
    return max(divisors)


def _tap_masks(h, w):
    """(9, 1, h*w) float32 0/1 validity masks per tap (t = kh*3 + kw)."""
    hw = h * w
    row = np.arange(hw, dtype=np.int64) // w
    col = np.arange(hw, dtype=np.int64) % w
    masks = np.ones((9, 1, hw), dtype=np.float32)
    for kh in range(3):
        for kw in range(3):
            dh, dw = kh - 1, kw - 1
            valid = np.ones(hw, dtype=bool)
            if dh == -1:
                valid &= row >= 1
            elif dh == 1:
                valid &= row < h - 1
            if dw == -1:
                valid &= col >= 1
            elif dw == 1:
                valid &= col < w - 1
            masks[kh * 3 + kw, 0, :] = valid.astype(np.float32)
    return jnp.asarray(masks)


# --------------------------------------------------------------------------- #
# Public entry point
# --------------------------------------------------------------------------- #
def cd_conv(x_nchw, weight, bias, theta=0.7):
    """x_nchw: (N, G0, H, W); weight: (G, G0, 3, 3) [OIHW]; bias: (G,).

    Returns (N, G0 + G, H, W), matching PyTorch CD_Conv.forward.
    """
    N, Cin, H, W = x_nchw.shape
    Cout = weight.shape[0]
    HW = H * W
    itemsize = x_nchw.dtype.itemsize

    # ---- trace-time theta fold:
    #   conv(x, w) + b - theta*(conv1x1(x, sum_hw w) + b)
    #   == conv(x, w_cd) + b*(1-theta), center tap absorbing -theta*w_sum.
    w_sum = jnp.sum(weight, axis=(2, 3))                       # (Cout, Cin)
    w_cd = weight.at[:, :, 1, 1].add(-theta * w_sum)           # (Cout, Cin, 3, 3)
    w_taps = jnp.transpose(w_cd, (2, 3, 0, 1)).reshape(9, Cout, Cin)
    b_eff = (bias * (1.0 - theta)).reshape(Cout, 1)
    masks = _tap_masks(H, W)                                   # (9, 1, HW)

    # ---- raw input, flattened spatial on lanes (free reshape).
    x_flat = x_nchw.reshape(N, Cin, HW)

    # ---- generation-aware blocking + VMEM budget.
    multi_core = _tensorcores_per_chip() >= 2
    # double-buffered input block + output block per image
    per_img_pipe = 2 * (Cin + (Cin + Cout)) * HW * itemsize
    target_bytes = (4 << 20) if multi_core else (8 << 20)
    NB = _pick_block_batch(N, per_img_pipe, multi_core, target_bytes)
    grid = (N // NB,)

    const_bytes = 2 * (w_taps.size + b_eff.size + masks.size) * 4
    need = NB * per_img_pipe + const_bytes + (2 << 20)
    vmem_cap = (48 << 20) if multi_core else (96 << 20)
    vmem_limit = int(min(max(need, 16 << 20), vmem_cap))

    cost = pl.CostEstimate(
        flops=2 * N * Cout * 9 * Cin * HW,
        transcendentals=0,
        bytes_accessed=int(
            (x_flat.size + w_taps.size + b_eff.size + masks.size
             + N * (Cin + Cout) * HW) * itemsize),
    )

    kernel = functools.partial(_cd_conv_kernel, NB, Cin, Cout, W, HW)

    out_flat = pl.pallas_call(
        kernel,
        out_shape=jax.ShapeDtypeStruct((N, Cin + Cout, HW), x_nchw.dtype),
        grid_spec=pltpu.PrefetchScalarGridSpec(
            num_scalar_prefetch=0,
            grid=grid,
            in_specs=[
                pl.BlockSpec((NB, Cin, HW), lambda n: (n, 0, 0)),
                pl.BlockSpec((9, Cout, Cin), lambda n: (0, 0, 0)),
                pl.BlockSpec((Cout, 1), lambda n: (0, 0)),
                pl.BlockSpec((9, 1, HW), lambda n: (0, 0, 0)),
            ],
            out_specs=pl.BlockSpec((NB, Cin + Cout, HW), lambda n: (n, 0, 0)),
        ),
        compiler_params=pltpu.CompilerParams(
            dimension_semantics=("parallel",),
            vmem_limit_bytes=vmem_limit),
        cost_estimate=cost,
    )(x_flat, w_taps, b_eff, masks)

    # Contiguous reshape only — already channel-first (NCHW).
    return out_flat.reshape(N, Cin + Cout, H, W)


# --------------------------------------------------------------------------- #
# Pure-JAX reference (mirrors the PyTorch module) for verification
# --------------------------------------------------------------------------- #
def _reference(x_nchw, weight, bias, theta=0.7):
    out_normal = jax.lax.conv_general_dilated(
        x_nchw, weight, window_strides=(1, 1), padding=((1, 1), (1, 1)),
        dimension_numbers=("NCHW", "OIHW", "NCHW"))
    out_normal = out_normal + bias[None, :, None, None]
    kdiff = jnp.sum(weight, axis=(2, 3))[:, :, None, None]
    out_diff = jax.lax.conv_general_dilated(
        x_nchw, kdiff, window_strides=(1, 1), padding=((0, 0), (0, 0)),
        dimension_numbers=("NCHW", "OIHW", "NCHW"))
    out_diff = out_diff + bias[None, :, None, None]
    buf = out_normal - theta * out_diff
    act = jnp.where(buf >= 0.0, buf, 0.1 * buf)
    return jnp.concatenate([x_nchw, act], axis=1)


if __name__ == "__main__":
    # Small shapes: N=2, G0=4 input channels, G=8 conv output channels, 16x16.
    N, G0, G, H, W = 2, 4, 8, 16, 16

    key = jax.random.PRNGKey(0)
    kx, kw, kb = jax.random.split(key, 3)

    x = jax.random.normal(kx, (N, G0, H, W), dtype=jnp.float32)
    fan_in = G0 * 3 * 3
    bound = 1.0 / (fan_in ** 0.5)
    weight = jax.random.uniform(kw, (G, G0, 3, 3), jnp.float32, -bound, bound)
    bias = jax.random.uniform(kb, (G,), jnp.float32, -bound, bound)

    out = cd_conv(x, weight, bias, theta=0.7)
    out = jax.block_until_ready(out)

    ref = _reference(x, weight, bias, theta=0.7)
    assert out.shape == (N, G0 + G, H, W)
    assert jnp.allclose(out, ref, atol=1e-4, rtol=1e-4)

    print("KERNEL_OK")
</pallas_src>

<mosaic_0001>
module attributes {stable_mosaic.version = 11 : i64} {
  func.func @_cd_conv_kernel(%arg0: i32, %arg1: memref<1x4x256xf32, #tpu.memory_space<vmem>>, %arg2: memref<9x8x4xf32, #tpu.memory_space<vmem>>, %arg3: memref<8x1xf32, #tpu.memory_space<vmem>>, %arg4: memref<9x1x256xf32, #tpu.memory_space<vmem>>, %arg5: memref<1x12x256xf32, #tpu.memory_space<vmem>>) attributes {dimension_semantics = [#tpu.dimension_semantics<parallel>], iteration_bounds = array<i64: 2>, scalar_prefetch = 0 : i64, scratch_operands = 0 : i64, tpu.core_type = #tpu.core_type<tc>, window_params = [{transform_indices = @transform_0, window_bounds = array<i64: 1, 4, 256>}, {pipeline_mode = #tpu.pipeline_mode<synchronous>, transform_indices = @transform_1, window_bounds = array<i64: 9, 8, 4>}, {pipeline_mode = #tpu.pipeline_mode<synchronous>, transform_indices = @transform_2, window_bounds = array<i64: 8, 1>}, {pipeline_mode = #tpu.pipeline_mode<synchronous>, transform_indices = @transform_3, window_bounds = array<i64: 9, 1, 256>}, {transform_indices = @transform_4, window_bounds = array<i64: 1, 12, 256>}]} {
    %c0 = arith.constant 0 : index
    %c0_0 = arith.constant 0 : index
    %c0_1 = arith.constant 0 : index
    %0 = vector.load %arg2[%c0, %c0_0, %c0_1] : memref<9x8x4xf32, #tpu.memory_space<vmem>>, vector<1x8x4xf32>
    %1 = vector.shape_cast %0 : vector<1x8x4xf32> to vector<8x4xf32>
    %c1 = arith.constant 1 : index
    %c0_2 = arith.constant 0 : index
    %c0_3 = arith.constant 0 : index
    %2 = vector.load %arg2[%c1, %c0_2, %c0_3] : memref<9x8x4xf32, #tpu.memory_space<vmem>>, vector<1x8x4xf32>
    %3 = vector.shape_cast %2 : vector<1x8x4xf32> to vector<8x4xf32>
    %c2 = arith.constant 2 : index
    %c0_4 = arith.constant 0 : index
    %c0_5 = arith.constant 0 : index
    %4 = vector.load %arg2[%c2, %c0_4, %c0_5] : memref<9x8x4xf32, #tpu.memory_space<vmem>>, vector<1x8x4xf32>
    %5 = vector.shape_cast %4 : vector<1x8x4xf32> to vector<8x4xf32>
    %c3 = arith.constant 3 : index
    %c0_6 = arith.constant 0 : index
    %c0_7 = arith.constant 0 : index
    %6 = vector.load %arg2[%c3, %c0_6, %c0_7] : memref<9x8x4xf32, #tpu.memory_space<vmem>>, vector<1x8x4xf32>
    %7 = vector.shape_cast %6 : vector<1x8x4xf32> to vector<8x4xf32>
    %c4 = arith.constant 4 : index
    %c0_8 = arith.constant 0 : index
    %c0_9 = arith.constant 0 : index
    %8 = vector.load %arg2[%c4, %c0_8, %c0_9] : memref<9x8x4xf32, #tpu.memory_space<vmem>>, vector<1x8x4xf32>
    %9 = vector.shape_cast %8 : vector<1x8x4xf32> to vector<8x4xf32>
    %c5 = arith.constant 5 : index
    %c0_10 = arith.constant 0 : index
    %c0_11 = arith.constant 0 : index
    %10 = vector.load %arg2[%c5, %c0_10, %c0_11] : memref<9x8x4xf32, #tpu.memory_space<vmem>>, vector<1x8x4xf32>
    %11 = vector.shape_cast %10 : vector<1x8x4xf32> to vector<8x4xf32>
    %c6 = arith.constant 6 : index
    %c0_12 = arith.constant 0 : index
    %c0_13 = arith.constant 0 : index
    %12 = vector.load %arg2[%c6, %c0_12, %c0_13] : memref<9x8x4xf32, #tpu.memory_space<vmem>>, vector<1x8x4xf32>
    %13 = vector.shape_cast %12 : vector<1x8x4xf32> to vector<8x4xf32>
    %c7 = arith.constant 7 : index
    %c0_14 = arith.constant 0 : index
    %c0_15 = arith.constant 0 : index
    %14 = vector.load %arg2[%c7, %c0_14, %c0_15] : memref<9x8x4xf32, #tpu.memory_space<vmem>>, vector<1x8x4xf32>
    %15 = vector.shape_cast %14 : vector<1x8x4xf32> to vector<8x4xf32>
    %c8 = arith.constant 8 : index
    %c0_16 = arith.constant 0 : index
    %c0_17 = arith.constant 0 : index
    %16 = vector.load %arg2[%c8, %c0_16, %c0_17] : memref<9x8x4xf32, #tpu.memory_space<vmem>>, vector<1x8x4xf32>
    %17 = vector.shape_cast %16 : vector<1x8x4xf32> to vector<8x4xf32>
    %c0_18 = arith.constant 0 : index
    %c0_19 = arith.constant 0 : index
    %18 = vector.load %arg3[%c0_18, %c0_19] : memref<8x1xf32, #tpu.memory_space<vmem>>, vector<8x1xf32>
    %19 = vector.shape_cast %18 : vector<8x1xf32> to vector<8x1xf32>
    %20 = vector.broadcast %19 : vector<8x1xf32> to vector<8x256xf32>
    %c0_20 = arith.constant 0 : index
    %c0_21 = arith.constant 0 : index
    %c0_22 = arith.constant 0 : index
    %21 = vector.load %arg1[%c0_20, %c0_21, %c0_22] : memref<1x4x256xf32, #tpu.memory_space<vmem>>, vector<1x4x256xf32>
    %22 = vector.shape_cast %21 : vector<1x4x256xf32> to vector<4x256xf32>
    %c17_i32 = arith.constant 17 : i32
    %23 = tpu.dynamic_rotate %22 by %c17_i32 dim 1 : vector<4x256xf32>, i32 -> vector<4x256xf32>
    %c0_23 = arith.constant 0 : index
    %c0_24 = arith.constant 0 : index
    %c0_25 = arith.constant 0 : index
    %24 = vector.load %arg4[%c0_23, %c0_24, %c0_25] : memref<9x1x256xf32, #tpu.memory_space<vmem>>, vector<1x1x256xf32>
    %25 = vector.shape_cast %24 : vector<1x1x256xf32> to vector<1x256xf32>
    %26 = vector.broadcast %25 : vector<1x256xf32> to vector<4x256xf32>
    %27 = arith.mulf %23, %26 : vector<4x256xf32>
    %cst = arith.constant dense<0.000000e+00> : vector<8x256xf32>
    %28 = tpu.matmul %1, %27, %cst {dimension_numbers = #tpu.dot_dimension_numbers<[1], [0], [0], [1], [0, 0, 1, 1], [], []>} : vector<8x4xf32>, vector<4x256xf32>, vector<8x256xf32> -> vector<8x256xf32>
    %29 = arith.addf %20, %28 : vector<8x256xf32>
    %c16_i32 = arith.constant 16 : i32
    %30 = tpu.dynamic_rotate %22 by %c16_i32 dim 1 : vector<4x256xf32>, i32 -> vector<4x256xf32>
    %c1_26 = arith.constant 1 : index
    %c0_27 = arith.constant 0 : index
    %c0_28 = arith.constant 0 : index
    %31 = vector.load %arg4[%c1_26, %c0_27, %c0_28] : memref<9x1x256xf32, #tpu.memory_space<vmem>>, vector<1x1x256xf32>
    %32 = vector.shape_cast %31 : vector<1x1x256xf32> to vector<1x256xf32>
    %33 = vector.broadcast %32 : vector<1x256xf32> to vector<4x256xf32>
    %34 = arith.mulf %30, %33 : vector<4x256xf32>
    %cst_29 = arith.constant dense<0.000000e+00> : vector<8x256xf32>
    %35 = tpu.matmul %3, %34, %cst_29 {dimension_numbers = #tpu.dot_dimension_numbers<[1], [0], [0], [1], [0, 0, 1, 1], [], []>} : vector<8x4xf32>, vector<4x256xf32>, vector<8x256xf32> -> vector<8x256xf32>
    %36 = arith.addf %29, %35 : vector<8x256xf32>
    %c15_i32 = arith.constant 15 : i32
    %37 = tpu.dynamic_rotate %22 by %c15_i32 dim 1 : vector<4x256xf32>, i32 -> vector<4x256xf32>
    %c2_30 = arith.constant 2 : index
    %c0_31 = arith.constant 0 : index
    %c0_32 = arith.constant 0 : index
    %38 = vector.load %arg4[%c2_30, %c0_31, %c0_32] : memref<9x1x256xf32, #tpu.memory_space<vmem>>, vector<1x1x256xf32>
    %39 = vector.shape_cast %38 : vector<1x1x256xf32> to vector<1x256xf32>
    %40 = vector.broadcast %39 : vector<1x256xf32> to vector<4x256xf32>
    %41 = arith.mulf %37, %40 : vector<4x256xf32>
    %cst_33 = arith.constant dense<0.000000e+00> : vector<8x256xf32>
    %42 = tpu.matmul %5, %41, %cst_33 {dimension_numbers = #tpu.dot_dimension_numbers<[1], [0], [0], [1], [0, 0, 1, 1], [], []>} : vector<8x4xf32>, vector<4x256xf32>, vector<8x256xf32> -> vector<8x256xf32>
    %43 = arith.addf %36, %42 : vector<8x256xf32>
    %c1_i32 = arith.constant 1 : i32
    %44 = tpu.dynamic_rotate %22 by %c1_i32 dim 1 : vector<4x256xf32>, i32 -> vector<4x256xf32>
    %c3_34 = arith.constant 3 : index
    %c0_35 = arith.constant 0 : index
    %c0_36 = arith.constant 0 : index
    %45 = vector.load %arg4[%c3_34, %c0_35, %c0_36] : memref<9x1x256xf32, #tpu.memory_space<vmem>>, vector<1x1x256xf32>
    %46 = vector.shape_cast %45 : vector<1x1x256xf32> to vector<1x256xf32>
    %47 = vector.broadcast %46 : vector<1x256xf32> to vector<4x256xf32>
    %48 = arith.mulf %44, %47 : vector<4x256xf32>
    %cst_37 = arith.constant dense<0.000000e+00> : vector<8x256xf32>
    %49 = tpu.matmul %7, %48, %cst_37 {dimension_numbers = #tpu.dot_dimension_numbers<[1], [0], [0], [1], [0, 0, 1, 1], [], []>} : vector<8x4xf32>, vector<4x256xf32>, vector<8x256xf32> -> vector<8x256xf32>
    %50 = arith.addf %43, %49 : vector<8x256xf32>
    %cst_38 = arith.constant dense<0.000000e+00> : vector<8x256xf32>
    %51 = tpu.matmul %9, %22, %cst_38 {dimension_numbers = #tpu.dot_dimension_numbers<[1], [0], [0], [1], [0, 0, 1, 1], [], []>} : vector<8x4xf32>, vector<4x256xf32>, vector<8x256xf32> -> vector<8x256xf32>
    %52 = arith.addf %50, %51 : vector<8x256xf32>
    %c255_i32 = arith.constant 255 : i32
    %53 = tpu.dynamic_rotate %22 by %c255_i32 dim 1 : vector<4x256xf32>, i32 -> vector<4x256xf32>
    %c5_39 = arith.constant 5 : index
    %c0_40 = arith.constant 0 : index
    %c0_41 = arith.constant 0 : index
    %54 = vector.load %arg4[%c5_39, %c0_40, %c0_41] : memref<9x1x256xf32, #tpu.memory_space<vmem>>, vector<1x1x256xf32>
    %55 = vector.shape_cast %54 : vector<1x1x256xf32> to vector<1x256xf32>
    %56 = vector.broadcast %55 : vector<1x256xf32> to vector<4x256xf32>
    %57 = arith.mulf %53, %56 : vector<4x256xf32>
    %cst_42 = arith.constant dense<0.000000e+00> : vector<8x256xf32>
    %58 = tpu.matmul %11, %57, %cst_42 {dimension_numbers = #tpu.dot_dimension_numbers<[1], [0], [0], [1], [0, 0, 1, 1], [], []>} : vector<8x4xf32>, vector<4x256xf32>, vector<8x256xf32> -> vector<8x256xf32>
    %59 = arith.addf %52, %58 : vector<8x256xf32>
    %c241_i32 = arith.constant 241 : i32
    %60 = tpu.dynamic_rotate %22 by %c241_i32 dim 1 : vector<4x256xf32>, i32 -> vector<4x256xf32>
    %c6_43 = arith.constant 6 : index
    %c0_44 = arith.constant 0 : index
    %c0_45 = arith.constant 0 : index
    %61 = vector.load %arg4[%c6_43, %c0_44, %c0_45] : memref<9x1x256xf32, #tpu.memory_space<vmem>>, vector<1x1x256xf32>
    %62 = vector.shape_cast %61 : vector<1x1x256xf32> to vector<1x256xf32>
    %63 = vector.broadcast %62 : vector<1x256xf32> to vector<4x256xf32>
    %64 = arith.mulf %60, %63 : vector<4x256xf32>
    %cst_46 = arith.constant dense<0.000000e+00> : vector<8x256xf32>
    %65 = tpu.matmul %13, %64, %cst_46 {dimension_numbers = #tpu.dot_dimension_numbers<[1], [0], [0], [1], [0, 0, 1, 1], [], []>} : vector<8x4xf32>, vector<4x256xf32>, vector<8x256xf32> -> vector<8x256xf32>
    %66 = arith.addf %59, %65 : vector<8x256xf32>
    %c240_i32 = arith.constant 240 : i32
    %67 = tpu.dynamic_rotate %22 by %c240_i32 dim 1 : vector<4x256xf32>, i32 -> vector<4x256xf32>
    %c7_47 = arith.constant 7 : index
    %c0_48 = arith.constant 0 : index
    %c0_49 = arith.constant 0 : index
    %68 = vector.load %arg4[%c7_47, %c0_48, %c0_49] : memref<9x1x256xf32, #tpu.memory_space<vmem>>, vector<1x1x256xf32>
    %69 = vector.shape_cast %68 : vector<1x1x256xf32> to vector<1x256xf32>
    %70 = vector.broadcast %69 : vector<1x256xf32> to vector<4x256xf32>
    %71 = arith.mulf %67, %70 : vector<4x256xf32>
    %cst_50 = arith.constant dense<0.000000e+00> : vector<8x256xf32>
    %72 = tpu.matmul %15, %71, %cst_50 {dimension_numbers = #tpu.dot_dimension_numbers<[1], [0], [0], [1], [0, 0, 1, 1], [], []>} : vector<8x4xf32>, vector<4x256xf32>, vector<8x256xf32> -> vector<8x256xf32>
    %73 = arith.addf %66, %72 : vector<8x256xf32>
    %c239_i32 = arith.constant 239 : i32
    %74 = tpu.dynamic_rotate %22 by %c239_i32 dim 1 : vector<4x256xf32>, i32 -> vector<4x256xf32>
    %c8_51 = arith.constant 8 : index
    %c0_52 = arith.constant 0 : index
    %c0_53 = arith.constant 0 : index
    %75 = vector.load %arg4[%c8_51, %c0_52, %c0_53] : memref<9x1x256xf32, #tpu.memory_space<vmem>>, vector<1x1x256xf32>
    %76 = vector.shape_cast %75 : vector<1x1x256xf32> to vector<1x256xf32>
    %77 = vector.broadcast %76 : vector<1x256xf32> to vector<4x256xf32>
    %78 = arith.mulf %74, %77 : vector<4x256xf32>
    %cst_54 = arith.constant dense<0.000000e+00> : vector<8x256xf32>
    %79 = tpu.matmul %17, %78, %cst_54 {dimension_numbers = #tpu.dot_dimension_numbers<[1], [0], [0], [1], [0, 0, 1, 1], [], []>} : vector<8x4xf32>, vector<4x256xf32>, vector<8x256xf32> -> vector<8x256xf32>
    %80 = arith.addf %73, %79 : vector<8x256xf32>
    %cst_55 = arith.constant 0.000000e+00 : f32
    %81 = vector.broadcast %cst_55 : f32 to vector<8x256xf32>
    %82 = arith.cmpf oge, %80, %81 : vector<8x256xf32>
    %cst_56 = arith.constant 1.000000e-01 : f32
    %83 = vector.broadcast %cst_56 : f32 to vector<8x256xf32>
    %84 = arith.mulf %83, %80 : vector<8x256xf32>
    %85 = arith.select %82, %80, %84 : vector<8x256xi1>, vector<8x256xf32>
    %c0_57 = arith.constant 0 : index
    %c0_58 = arith.constant 0 : index
    %c0_59 = arith.constant 0 : index
    %86 = vector.load %arg5[%c0_57, %c0_58, %c0_59] : memref<1x12x256xf32, #tpu.memory_space<vmem>>, vector<1x4x256xf32>
    %87 = vector.shape_cast %86 : vector<1x4x256xf32> to vector<4x256xf32>
    %88 = vector.shape_cast %22 : vector<4x256xf32> to vector<1x4x256xf32>
    tpu.vector_store %arg5[%c0_57, %c0_58, %c0_59], %88 {strides = array<i32>} : memref<1x12x256xf32, #tpu.memory_space<vmem>>, vector<1x4x256xf32>,
    %c0_60 = arith.constant 0 : index
    %c4_61 = arith.constant 4 : index
    %c0_62 = arith.constant 0 : index
    %89 = vector.load %arg5[%c0_60, %c4_61, %c0_62] : memref<1x12x256xf32, #tpu.memory_space<vmem>>, vector<1x8x256xf32>
    %90 = vector.shape_cast %89 : vector<1x8x256xf32> to vector<8x256xf32>
    %91 = vector.shape_cast %85 : vector<8x256xf32> to vector<1x8x256xf32>
    tpu.vector_store %arg5[%c0_60, %c4_61, %c0_62], %91 {strides = array<i32>} : memref<1x12x256xf32, #tpu.memory_space<vmem>>, vector<1x8x256xf32>,
    return
  }
  func.func @transform_0(%arg0: i32) -> (i32, i32, i32) {
    %c0_i32 = arith.constant 0 : i32
    %c0_i32_0 = arith.constant 0 : i32
    %c0_i32_1 = arith.constant 0 : i32
    return %arg0, %c0_i32, %c0_i32_0 : i32, i32, i32
  }
  func.func @transform_1(%arg0: i32) -> (i32, i32, i32) {
    %c0_i32 = arith.constant 0 : i32
    %c0_i32_0 = arith.constant 0 : i32
    %c0_i32_1 = arith.constant 0 : i32
    %c0_i32_2 = arith.constant 0 : i32
    return %c0_i32, %c0_i32_0, %c0_i32_1 : i32, i32, i32
  }
  func.func @transform_2(%arg0: i32) -> (i32, i32) {
    %c0_i32 = arith.constant 0 : i32
    %c0_i32_0 = arith.constant 0 : i32
    %c0_i32_1 = arith.constant 0 : i32
    return %c0_i32, %c0_i32_0 : i32, i32
  }
  func.func @transform_3(%arg0: i32) -> (i32, i32, i32) {
    %c0_i32 = arith.constant 0 : i32
    %c0_i32_0 = arith.constant 0 : i32
    %c0_i32_1 = arith.constant 0 : i32
    %c0_i32_2 = arith.constant 0 : i32
    return %c0_i32, %c0_i32_0, %c0_i32_1 : i32, i32, i32
  }
  func.func @transform_4(%arg0: i32) -> (i32, i32, i32) {
    %c0_i32 = arith.constant 0 : i32
    %c0_i32_0 = arith.constant 0 : i32
    %c0_i32_1 = arith.constant 0 : i32
    return %arg0, %c0_i32, %c0_i32_0 : i32, i32, i32
  }
}

</mosaic_0001>

<bundles_post_ra>
// kernel: tpu_custom_call.1
= control target key start
LH: loop header
LB: loop body
LE: loop exit
PB: predicated region body
PF: predicated region fallthrough
CT: control target
= control target key end

     0   :  { %s1349_s15 = smov 0   ;;  %s1520_s0 = inlined_call_operand.vmem [shape: f32[2,4,256], index: 0, kind: input, shape index: {}]   ;;  %s1521_s1 = inlined_call_operand.vmem [shape: f32[9,8,4], index: 1, kind: input, shape index: {}]   ;;  %s1522_s2 = inlined_call_operand.vmem [shape: f32[8,1], index: 2, kind: input, shape index: {}]   ;;  %s1523_s3 = inlined_call_operand.vmem [shape: f32[9,1,256], index: 3, kind: input, shape index: {}]   ;;  %s1524_s4 = inlined_call_operand.vmem [shape: f32[2,12,256], index: 4, kind: output, shape index: {}]  }
   0x1 LB: > { %s1213_s16 = sadd.s32 4294967295, %s1312_s15   ;;  %p1217_p0 = scmp.ge.s32.totalorder %s1312_s15, 1  ;;  %s1312_s15 = sphi %s1349_s15, %s14_s15  }
   0x2   : > { %p162_p1 = scmp.lt.s32.totalorder %s1312_s15, 3 }
   0x4   : > { %p163_p2 = pnand %p1217_p0, %p162_p1 }
   0x5   : > { %p188_p3 = scmp.lt.s32.totalorder (!%p163_p2), %s1213_s16, 1  ;;  %v1314_v0 = vmov (!%p163_p2), 0.0   ;;  %vm252_vm0 = vcmask (!%p163_p2), 1043456   ;;  %s1315_s21 = smov (!%p163_p2), 127   ;;  %v1225_v3 = vld [vmem:[%s1521_s1 + $0x20] sm:$0xff] (!%p163_p2)  ;;  %vm248_vm1 = vcmask (!%p163_p2), 31744   ;;  %v229_v6 = vlaneseq (!%p163_p2) }
   0x6   : > { %166 = sbr.rel (%p163_p2) target bundleno = 388 (0x184), region = 36  ;;  %715 = vmatprep.mubr.f32.mxu0 (!%p163_p2), %v1314_v0  ;;  %323 = vmatprep.mubr.f32.mxu1 (!%p163_p2), %v1314_v0  ;;  %s1316_s22 = smov (!%p163_p2), 17   ;;  %v1321_v4 = vmov (!%p163_p2), 0   ;;  %v215_v5 = vld [vmem:[%s1522_s2] sm:$0xff] (!%p163_p2)  ;;  %v1248_v11 = vld [vmem:[%s1523_s3 + $0xa] sm:$0x3] (!%p163_p2) }
   0x7   : > { %s1317_s25 = smov (!%p163_p2), 16   ;;  %s1318_s26 = smov (!%p163_p2), 113   ;;  %1304 = vset.pattern.permute.xlu0 (!%p163_p2), %v1321_v4  ;;  %v237_v7 = vshrl.u32 (!%p163_p2), %v229_v6, 7  ;;  %v1399_v8 = vand.u32 (!%p163_p2), 127, %v229_v6  ;;  %v234_v12 = vld [vmem:[%s1523_s3] sm:$0x3] (!%p163_p2) }
   0x8   : > { %s1319_s27 = smov (!%p163_p2), 15   ;;  %s1320_s28 = smov (!%p163_p2), 112   ;;  %v1233_v15 = vld [vmem:[%s1523_s3 + $0x2] sm:$0x3] (!%p163_p2)  ;;  %v1252_v32 = vld [vmem:[%s1523_s3 + $0xc] sm:$0x3] (!%p163_p2) }
   0x9   : > { %s1322_s29 = smov (!%p163_p2), 1   ;;  %s1323_s30 = smov (!%p163_p2), 111   ;;  %v1401_v9 = vsub.s32 (!%p163_p2), 0, %v237_v7  ;;  %v1403_v10 = vsub.s32 (!%p163_p2), 1, %v237_v7  ;;  %vm728_vm2 = vcmp.lt.s32.totalorder (!%p163_p2), %v1399_v8, 127  ;;  %vm231_vm3 = vcmp.lt.s32.totalorder (!%p163_p2), %v1399_v8, 17 }
   0xa   : > { %vm336_vm4 = vcmp.lt.s32.totalorder (!%p163_p2), %v1399_v8, 16  ;;  %v198_v33 = vld [vmem:[%s1521_s1] sm:$0xff] (!%p163_p2)  ;;  %v1226_v34 = vld [vmem:[%s1521_s1 + $0x28] sm:$0xff] (!%p163_p2)  ;;  %vm832_vm5 = vcmp.lt.s32.totalorder (!%p163_p2), %v1399_v8, 113  ;;  %vm440_vm6 = vcmp.lt.s32.totalorder (!%p163_p2), %v1399_v8, 15  ;;  %v1227_v54 = vld [vmem:[%s1521_s1 + $0x30] sm:$0xff] (!%p163_p2) }
   0xb   : > { %v737_v16 = vrot.slane (!%p163_p2), %v1248_v11, %v1401_v9  ;;  %v741_v17 = vrot.slane (!%p163_p2), %v1248_v11, %v1403_v10  ;;  %v239_v18 = vrot.slane (!%p163_p2), %v234_v12, %v1401_v9  ;;  %v243_v19 = vrot.slane (!%p163_p2), %v234_v12, %v1403_v10  ;;  %v1237_v43 = vld [vmem:[%s1523_s3 + $0x4] sm:$0x3] (!%p163_p2)  ;;  %v1256_v52 = vld [vmem:[%s1523_s3 + $0xe] sm:$0x3] (!%p163_p2)  ;;  %v1241_v63 = vld [vmem:[%s1523_s3 + $0x6] sm:$0x3] (!%p163_p2) }
   0xc   : > { %v345_v22 = vrot.slane (!%p163_p2), %v1233_v15, %v1401_v9  ;;  %v349_v23 = vrot.slane (!%p163_p2), %v1233_v15, %v1403_v10  ;;  %v841_v39 = vrot.slane (!%p163_p2), %v1252_v32, %v1401_v9  ;;  %v845_v42 = vrot.slane (!%p163_p2), %v1252_v32, %v1403_v10  ;;  %v1222_v53 = vld [vmem:[%s1521_s1 + $0x8] sm:$0xff] (!%p163_p2)  ;;  %v1223_v15 = vld [vmem:[%s1521_s1 + $0x10] sm:$0xff] (!%p163_p2) }
   0xd   : > { %s1526_s16 = smov (!%p188_p3, %s1213_s16), 1  ;;  %v449_v50 = vrot.slane %v1237_v43, %v1401_v9  ;;  %v453_v51 = vrot.slane %v1237_v43, %v1403_v10  ;;  %v945_v59 = vrot.slane %v1256_v52, %v1401_v9  ;;  %vm936_vm7 = vcmp.lt.s32.totalorder %v1399_v8, 112 }
   0xe   : > { %s1266_s17 = sshll.u32 %s1526_s16, 3  ;;  %v949_v62 = vrot.slane %v1256_v52, %v1403_v10  ;;  %vm544_vm8 = vcmp.lt.s32.totalorder %v1399_v8, 1  ;;  %v553_v12 = vrot.slane %v1241_v63, %v1401_v9  ;;  %vm1040_vm9 = vcmp.lt.s32.totalorder %v1399_v8, 111  ;;  %v1224_v8 = vld [vmem:[%s1521_s1 + $0x18] sm:$0xff] }
   0xf   : > { %s192_s20 = scalar_lea.vmem %s1520_s0, %s1266_s17  ;;  %s1267_s17 = sshll.u32 %s1526_s16, 5 }
  0x10   : > { %v1365_v1 = vld [vmem:[%s192_s20] sm:$0xff]  ;;  %s197_s20 = scalar_lea.vmem %s1524_s4, %s1267_s17 }
  0x11   : > { %724 = vrot.lane.b32.xlu1 %v1365_v1, %s1315_s21  ;;  %225 = vrot.lane.b32.xlu0 %v1365_v1, %s1316_s22  ;;  %v1371_v2 = vcombine.high %v1365_v1, %v1365_v1  ;;  %1146 = vst [vmem:[%s197_s20] sm:$0xf] %v1365_v1 }
  0x13   : > { %1245 = vmatprep.subr.msk.mxu0 %vm252_vm0, %v1371_v2  ;;  %1147 = vst [vmem:[%s197_s20 + $0x8] sm:$0xf] %v1371_v2 }
  0x14   : > { %1246 = vmatpush1.msk.msra.mxu0 %vm252_vm0, %v1365_v1 }
  0x15   : > { %726 = vrot.lane.b32.xlu1 %v1371_v2, %s1315_s21  ;;  %227 = vrot.lane.b32.xlu0 %v1371_v2, %s1316_s22 }
  0x16   : > { %1247 = vmatmul.mubr.msk.f32.vlgmr.msra.gmra.mrb[0].mxu0 %vm248_vm1, %v1225_v3 }
  0x17   : > { %819 = vmatprep.mubr.f32.mxu0 %v1314_v0 }
  0x19   : > { %334 = vrot.lane.b32.xlu1 %v1371_v2, %s1317_s25  ;;  %332 = vrot.lane.b32.xlu0 %v1365_v1, %s1317_s25 }
  0x1d   : > { %830 = vrot.lane.b32.xlu1 %v1371_v2, %s1318_s26  ;;  %828 = vrot.lane.b32.xlu0 %v1365_v1, %s1318_s26 }
  0x21   : > { %438 = vrot.lane.b32.xlu1 %v1371_v2, %s1319_s27  ;;  %436 = vrot.lane.b32.xlu0 %v1365_v1, %s1319_s27 }
  0x25   : > { %934 = vrot.lane.b32.xlu1 %v1371_v2, %s1320_s28  ;;  %932 = vrot.lane.b32.xlu0 %v1365_v1, %s1320_s28 }
  0x29   : > { %542 = vrot.lane.b32.xlu1 %v1371_v2, %s1322_s29  ;;  %540 = vrot.lane.b32.xlu0 %v1365_v1, %s1322_s29 }
  0x2d   : > { %1038 = vrot.lane.b32.xlu1 %v1371_v2, %s1323_s30  ;;  %1036 = vrot.lane.b32.xlu0 %v1365_v1, %s1323_s30 }
  0x31   : > { %218 = vperm.xlu0 %1304, %v215_v5  }
  0x83   : > { %v725_v13 = vpop.permute.xlu1 %724  ;;  %v226_v14 = vpop.permute.xlu0 %225 }
  0x87   : > { %v727_v20 = vpop.permute.xlu1 %726  ;;  %v228_v21 = vpop.permute.xlu0 %227 }
  0x88   : > { %v729_v24 = vsel %vm728_vm2, %v725_v13, %v727_v20  ;;  %v730_v25 = vsel %vm728_vm2, %v727_v20, %v725_v13  ;;  %v232_v26 = vsel %vm231_vm3, %v226_v14, %v228_v21  ;;  %v233_v27 = vsel %vm231_vm3, %v228_v21, %v226_v14  ;;  %v1260_v14 = vld [vmem:[%s1523_s3 + $0x10] sm:$0x3] }
  0x89   : > { %v744_v28 = vmul.f32 %v737_v16, %v729_v24  ;;  %v745_v29 = vmul.f32 %v741_v17, %v730_v25  ;;  %v246_v30 = vmul.f32 %v239_v18, %v233_v27  ;;  %v247_v31 = vmul.f32 %v243_v19, %v232_v26  ;;  %v1228_v16 = vld [vmem:[%s1521_s1 + $0x38] sm:$0xff] }
  0x8a   : > { %v557_v13 = vrot.slane %v1241_v63, %v1403_v10  ;;  %v1049_v21 = vrot.slane %v1260_v14, %v1401_v9  ;;  %v1053_v24 = vrot.slane %v1260_v14, %v1403_v10  ;;  %v1229_v10 = vld [vmem:[%s1521_s1 + $0x40] sm:$0xff] }
  0x8b   : > { %v335_v35 = vpop.permute.xlu1 %334  ;;  %1230 = vmatprep.subr.msk.mxu1 %vm252_vm0, %v247_v31  ;;  %v333_v36 = vpop.permute.xlu0 %332  ;;  %1249 = vmatprep.subr.msk.mxu0 %vm252_vm0, %v745_v29 }
  0x8c   : > { %v337_v37 = vsel %vm336_vm4, %v333_v36, %v335_v35  ;;  %v338_v38 = vsel %vm336_vm4, %v335_v35, %v333_v36  ;;  %1231 = vmatpush1.msk.msra.mxu1 %vm252_vm0, %v246_v30  ;;  %1250 = vmatpush1.msk.msra.mxu0 %vm252_vm0, %v744_v28 }
  0x8d   : > { %v352_v40 = vmul.f32 %v345_v22, %v338_v38  ;;  %v353_v41 = vmul.f32 %v349_v23, %v337_v37  ;;  %1232 = vmatmul.mubr.msk.f32.vlgmr.msra.gmra.mrb[0].mxu1 %vm248_vm1, %v198_v33  ;;  %1251 = vmatmul.mubr.msk.f32.vlgmr.msra.gmra.mrb[0].mxu0 %vm248_vm1, %v1226_v34 }
  0x8e   : > { %427 = vmatprep.mubr.f32.mxu1 %v1314_v0  ;;  %923 = vmatprep.mubr.f32.mxu0 %v1314_v0 }
  0x8f   : > { %v831_v44 = vpop.permute.xlu1 %830  ;;  %1234 = vmatprep.subr.msk.mxu1 %vm252_vm0, %v353_v41  ;;  %v829_v45 = vpop.permute.xlu0 %828 }
  0x90   : > { %v833_v46 = vsel %vm832_vm5, %v829_v45, %v831_v44  ;;  %v834_v47 = vsel %vm832_vm5, %v831_v44, %v829_v45  ;;  %1235 = vmatpush1.msk.msra.mxu1 %vm252_vm0, %v352_v40 }
  0x91   : > { %v848_v48 = vmul.f32 %v841_v39, %v833_v46  ;;  %v849_v49 = vmul.f32 %v845_v42, %v834_v47 }
  0x93   : > { %v439_v55 = vpop.permute.xlu1 %438  ;;  %v437_v56 = vpop.permute.xlu0 %436  ;;  %1253 = vmatprep.subr.msk.mxu0 %vm252_vm0, %v849_v49 }
  0x94   : > { %v441_v57 = vsel %vm440_vm6, %v437_v56, %v439_v55  ;;  %v442_v58 = vsel %vm440_vm6, %v439_v55, %v437_v56  ;;  %1254 = vmatpush1.msk.msra.mxu0 %vm252_vm0, %v848_v48 }
  0x95   : > { %v456_v60 = vmul.f32 %v449_v50, %v442_v58  ;;  %v457_v61 = vmul.f32 %v453_v51, %v441_v57  ;;  %1236 = vmatmul.mubr.msk.f32.vlgmr.msra.gmra.mrb[0].mxu1 %vm248_vm1, %v1222_v53  ;;  %1255 = vmatmul.mubr.msk.f32.vlgmr.msra.gmra.mrb[0].mxu0 %vm248_vm1, %v1227_v54 }
  0x96   : > { %531 = vmatprep.mubr.f32.mxu1 %v1314_v0  ;;  %1027 = vmatprep.mubr.f32.mxu0 %v1314_v0 }
  0x97   : > { %v935_v3 = vpop.permute.xlu1 %934  ;;  %1238 = vmatprep.subr.msk.mxu1 %vm252_vm0, %v457_v61  ;;  %v933_v4 = vpop.permute.xlu0 %932 }
  0x98   : > { %v937_v5 = vsel %vm936_vm7, %v933_v4, %v935_v3  ;;  %v938_v6 = vsel %vm936_vm7, %v935_v3, %v933_v4  ;;  %1239 = vmatpush1.msk.msra.mxu1 %vm252_vm0, %v456_v60 }
  0x99   : > { %v952_v7 = vmul.f32 %v945_v59, %v937_v5  ;;  %v953_v11 = vmul.f32 %v949_v62, %v938_v6 }
  0x9b   : > { %v543_v17 = vpop.permute.xlu1 %542  ;;  %v541_v18 = vpop.permute.xlu0 %540  ;;  %1257 = vmatprep.subr.msk.mxu0 %vm252_vm0, %v953_v11 }
  0x9c   : > { %v545_v19 = vsel %vm544_vm8, %v541_v18, %v543_v17  ;;  %v546_v20 = vsel %vm544_vm8, %v543_v17, %v541_v18  ;;  %1258 = vmatpush1.msk.msra.mxu0 %vm252_vm0, %v952_v7 }
  0x9d   : > { %v560_v22 = vmul.f32 %v553_v12, %v546_v20  ;;  %v561_v23 = vmul.f32 %v557_v13, %v545_v19  ;;  %1240 = vmatmul.mubr.msk.f32.vlgmr.msra.gmra.mrb[0].mxu1 %vm248_vm1, %v1223_v15  ;;  %1259 = vmatmul.mubr.msk.f32.vlgmr.msra.gmra.mrb[0].mxu0 %vm248_vm1, %v1228_v16 }
  0x9e   : > { %635 = vmatprep.mubr.f32.mxu1 %v1314_v0  ;;  %1131 = vmatprep.mubr.f32.mxu0 %v1314_v0 }
  0x9f   : > { %v1039_v25 = vpop.permute.xlu1 %1038  ;;  %1242 = vmatprep.subr.msk.mxu1 %vm252_vm0, %v561_v23  ;;  %v1037_v26 = vpop.permute.xlu0 %1036 }
  0xa0   : > { %v1041_v9 = vsel %vm1040_vm9, %v1037_v26, %v1039_v25  ;;  %v1042_v27 = vsel %vm1040_vm9, %v1039_v25, %v1037_v26  ;;  %1243 = vmatpush1.msk.msra.mxu1 %vm252_vm0, %v560_v22 }
  0xa1   : > { %v1056_v28 = vmul.f32 %v1049_v21, %v1041_v9  ;;  %v1057_v29 = vmul.f32 %v1053_v24, %v1042_v27 }
  0xa3   : > { %1261 = vmatprep.subr.msk.mxu0 %vm252_vm0, %v1057_v29 }
  0xa4   : > { %1262 = vmatpush1.msk.msra.mxu0 %vm252_vm0, %v1056_v28 }
  0xa5   : > { %1244 = vmatmul.mubr.msk.f32.vlgmr.msra.gmra.mrb[0].mxu1 %vm248_vm1, %v1224_v8  ;;  %1263 = vmatmul.mubr.msk.f32.vlgmr.msra.gmra.mrb[0].mxu0 %vm248_vm1, %v1229_v10 }
  0xb0   : > { %v219_v0 = vpop.permute.xlu0 %218 }
 0x178   : > { %v637_v30 = vpop.f32.mrb[0].mxu1  ;;  %v1133_v31 = vpop.f32.mrb[0].mxu0 }
 0x179   : > { %v1268_v32 = vadd.f32 %v637_v30, %v219_v0  ;;  %v639_v33 = vpop.f32.mrb[1].mxu1  ;;  %v1135_v34 = vpop.f32.mrb[1].mxu0 }
 0x17a   : > { %v1270_v35 = vadd.f32 %v639_v33, %v219_v0 }
 0x17b   : > { %v1269_v36 = vadd.f32 %v1268_v32, %v1133_v31 }
 0x17c   : > { %v1271_v37 = vadd.f32 %v1270_v35, %v1135_v34 }
 0x17d   : > { %vm1140_vm10 = vcmp.ge.f32.partialorder %v1269_v36, 0.0  ;;  %v1142_v38 = vmul.f32 0.1, %v1269_v36 }
 0x17e   : > { %vm1141_vm11 = vcmp.ge.f32.partialorder %v1271_v37, 0.0  ;;  %v1143_v39 = vmul.f32 0.1, %v1271_v37 }
 0x17f   : > { %v1144_v40 = vsel %vm1140_vm10, %v1269_v36, %v1142_v38 }
 0x180   : > { %v1150_v41 = vrot.slane %v1144_v40, 4  ;;  %v1145_v42 = vsel %vm1141_vm11, %v1271_v37, %v1143_v39 }
 0x181   : > { %v1151_v43 = vrot.slane %v1145_v42, 4 }
 0x182   : > { %1154 = vst [vmem:[%s197_s20 + $0x10] ss:$-12 sps:$4 sm:$0xff] %v1150_v41  }
 0x183   : > { %1155 = vst [vmem:[%s197_s20 + $0x18] ss:$-12 sps:$4 sm:$0xff] %v1151_v43  }
 0x184 PF: > { %s14_s15 = sadd.s32 1, %s1312_s15  }
 0x185   : > { %p11_p4 = scmp.ge.s32.totalorder %s14_s15, 4  }
 0x187   :  { %13 = sbr.rel (!%p11_p4) target bundleno = 1 (0x1), region = 81 }

</bundles_post_ra>
